<compile_context>
chip_gen: v7x
topology: tpu7x:2x2x1
jax: 0.10.0
libtpu: 0.0.40
codegen_flags: <defaults>
</compile_context>

<pallas_src>
import functools

import jax
import jax.numpy as jnp
from jax.experimental import pallas as pl
from jax.experimental.pallas import tpu as pltpu


def _round_up(a: int, b: int) -> int:
    return -(-a // b) * b


def _conv_block_kernel(x_ref, w1_ref, w2_ref, o_ref, *, nb, h, w, l2, l3):
    """Fused ConvBlock for `nb` samples (one grid step).

    x_ref : (nb, Cin_p, L1)    zero-padded input canvases; pixel (y,x) at
                               flat index 2*(wp+1) + y*wp + x, wp = w+2.
    w1_ref: (9, Cout_p, Cin_p) conv1 weights, tap-major (t = dy*3 + dx).
    w2_ref: (9, Cout_p, Cout_p) conv2 weights.
    o_ref : (nb, Cout_p, L3)   outputs; pixel (y,x) at flat index y*wp + x.
    """
    wp = w + 2
    p2 = wp + 1                      # pixel offset inside the stage-1 activation
    inv_hw = 1.0 / float(h * w)
    eps = 1e-5
    cout_p = o_ref.shape[1]
    # tap t = dy*3 + dx reads the source at flat offset dy*wp + dx
    offs = [dy * wp + dx for dy in range(3) for dx in range(3)]

    def pixel_mask(length, pix_off):
        # (Cout_p, length) f32: 1.0 on real-pixel columns, 0.0 on pad / wrap / tail.
        # Built from iota + float division (exact for these magnitudes) so no
        # vector integer div/mod is needed and no mask input DMA exists.
        col = jax.lax.broadcasted_iota(jnp.int32, (cout_p, length), 1)
        rf = (col - pix_off).astype(jnp.float32)
        row = jnp.floor((rf + 0.5) / float(wp))
        x_in_row = rf - row * float(wp)          # exact integer in f32
        valid = (rf >= 0.0) & (rf < float(h * wp)) & (x_in_row < float(w))
        return valid.astype(jnp.float32)

    # Hoisted, sample-invariant masks (one broadcast each, reused below).
    mask1 = pixel_mask(l2, p2)
    mask2 = pixel_mask(l3, 0)

    w1 = w1_ref[...]
    w2 = w2_ref[...]

    def conv_in_lrelu(src, wt, out_len, mask, zero_borders):
        # 3x3 conv == 9 accumulating MXU matmuls over shifted views of the
        # flattened canvas (no concat, no im2col temp).
        acc = jnp.zeros((cout_p, out_len), jnp.float32)
        for t, o in enumerate(offs):
            acc = acc + jnp.dot(wt[t], src[:, o:o + out_len],
                                preferred_element_type=jnp.float32)
        # InstanceNorm2d (affine=False, eps=1e-5): stats over real pixels only,
        # kept in f32 regardless of the matmul dtype.
        accm = acc * mask
        mean = jnp.sum(accm, axis=1, keepdims=True) * inv_hw
        ex2 = jnp.sum(accm * acc, axis=1, keepdims=True) * inv_hw
        var = jnp.maximum(ex2 - mean * mean, 0.0)
        y = (acc - mean) * jax.lax.rsqrt(var + eps)
        y = jnp.maximum(y, 0.2 * y)              # LeakyReLU(0.2)
        if zero_borders:                         # supplies conv2's pad zeros
            y = y * mask
        return y

    for s in range(nb):                          # nb is small and static
        x_s = x_ref[s]                           # (Cin_p, L1)
        # stage 1: conv1 -> IN -> LeakyReLU   (Dropout2d = identity, eval mode)
        y1 = conv_in_lrelu(x_s, w1, l2, mask1, zero_borders=True)
        # stage 2: conv2 -> IN -> LeakyReLU; borders are stripped by the wrapper,
        # so no trailing mask multiply here.
        y2 = conv_in_lrelu(y1.astype(w2.dtype), w2, l3, mask2, zero_borders=False)
        o_ref[s] = y2.astype(o_ref.dtype)


def conv_block_forward(x_nchw: jax.Array, w1_oihw: jax.Array, w2_oihw: jax.Array,
                       *, matmul_dtype=jnp.float32) -> jax.Array:
    """ConvBlock forward. Input/output NCHW, matching the PyTorch module."""
    n, cin, h, w = x_nchw.shape
    cout = w1_oihw.shape[0]

    cin_p = _round_up(cin, 8)
    cout_p = _round_up(cout, 8)
    wp = w + 2
    span = h * wp
    p1 = 2 * (wp + 1)                 # pixel offset inside the input canvas

    # Per-stage lane lengths, all multiples of 128 (lane-dense loads/stores).
    l3 = _round_up(span, 128)                      # stage-2 / output frame
    l2 = _round_up(l3 + 2 * wp + 2, 128)           # stage-1 activation frame
    l1 = _round_up(l2 + 2 * wp + 2, 128)           # input canvas

    # Input canvas: channel-pad, add 2 zero cols per row, flatten spatial dims,
    # then front/back pad so pixel (y,x) sits at flat index p1 + y*wp + x.
    x = x_nchw.astype(jnp.float32)
    xc = jnp.pad(x, ((0, 0), (0, cin_p - cin), (0, 0), (0, 2)))
    xc = xc.reshape(n, cin_p, span)
    xc = jnp.pad(xc, ((0, 0), (0, 0), (p1, l1 - p1 - span)))
    xc = xc.astype(matmul_dtype)

    # Tap-major weights (9, Co_p, Ci_p), channels zero-padded to sublane multiples.
    def prep_w(wt, ci_p, co_p):
        wpad = jnp.pad(wt.astype(jnp.float32),
                       ((0, co_p - wt.shape[0]), (0, ci_p - wt.shape[1]),
                        (0, 0), (0, 0)))
        return jnp.transpose(wpad, (2, 3, 0, 1)).reshape(9, co_p, ci_p).astype(matmul_dtype)

    w1_t = prep_w(w1_oihw, cin_p, cout_p)
    w2_t = prep_w(w2_oihw, cout_p, cout_p)

    # Samples per grid step: amortize per-step overhead, but keep >= 2 grid steps
    # when n >= 2 so v7x can shard the "parallel" axis over both TensorCores.
    nb = 1 if n <= 2 else min(-(-n // 2), 8)
    itemsize = jnp.dtype(matmul_dtype).itemsize
    blk_bytes = 2 * nb * (cin_p * l1 * itemsize + cout_p * l3 * 4)   # double-buffered
    while nb > 1 and blk_bytes > (16 << 20):
        nb -= 1
        blk_bytes = 2 * nb * (cin_p * l1 * itemsize + cout_p * l3 * 4)
    num_steps = -(-n // nb)
    n_pad = num_steps * nb
    if n_pad > n:
        xc = jnp.pad(xc, ((0, n_pad - n), (0, 0), (0, 0)))

    vmem_limit = int(min(64 << 20, max(32 << 20, 4 * blk_bytes)))

    out = pl.pallas_call(
        functools.partial(_conv_block_kernel, nb=nb, h=h, w=w, l2=l2, l3=l3),
        out_shape=jax.ShapeDtypeStruct((n_pad, cout_p, l3), jnp.float32),
        grid=(num_steps,),
        in_specs=[
            pl.BlockSpec((nb, cin_p, l1), lambda i: (i, 0, 0)),
            pl.BlockSpec((9, cout_p, cin_p), lambda i: (0, 0, 0)),
            pl.BlockSpec((9, cout_p, cout_p), lambda i: (0, 0, 0)),
        ],
        out_specs=pl.BlockSpec((nb, cout_p, l3), lambda i: (i, 0, 0)),
        compiler_params=pltpu.CompilerParams(
            dimension_semantics=("parallel",),
            vmem_limit_bytes=vmem_limit),
    )(xc, w1_t, w2_t)

    # Strip pad/wrap columns and padded channels/samples -> (N, Cout, H, W).
    out = out[:n, :cout, :span].reshape(n, cout, h, wp)[:, :, :, :w]
    return out.astype(x_nchw.dtype)


def _reference_forward(x_nchw, w1, w2):
    """Plain-JAX reference for correctness checking."""
    def step(x, wt):
        y = jax.lax.conv_general_dilated(
            x, wt, window_strides=(1, 1), padding="SAME",
            dimension_numbers=("NCHW", "OIHW", "NCHW"),
            precision=jax.lax.Precision.HIGHEST)
        mean = jnp.mean(y, axis=(2, 3), keepdims=True)
        var = jnp.mean((y - mean) ** 2, axis=(2, 3), keepdims=True)
        y = (y - mean) / jnp.sqrt(var + 1e-5)
        return jnp.where(y >= 0, y, 0.2 * y)
    return step(step(x_nchw, w1), w2)


if __name__ == "__main__":
    # Module config: ConvBlock(in_chans=4, out_chans=8, drop_prob=0.1)
    in_chans, out_chans = 4, 8
    N, H, W = 2, 16, 16

    key = jax.random.PRNGKey(0)
    k_x, k_w1, k_w2 = jax.random.split(key, 3)

    x = jax.random.normal(k_x, (N, in_chans, H, W), dtype=jnp.float32)
    # Deterministic synthetic conv weights (PyTorch OIHW layout, bias=False).
    w1 = 0.1 * jax.random.normal(k_w1, (out_chans, in_chans, 3, 3), jnp.float32)
    w2 = 0.1 * jax.random.normal(k_w2, (out_chans, out_chans, 3, 3), jnp.float32)

    fwd = jax.jit(conv_block_forward)
    out = fwd(x, w1, w2)
    jax.block_until_ready(out)

    ref = _reference_forward(x, w1, w2)
    assert out.shape == (N, out_chans, H, W)
    assert jnp.allclose(out, ref, atol=5e-4, rtol=5e-4), "mismatch vs reference"

    print("KERNEL_OK")
</pallas_src>

<mosaic_0001>
module attributes {stable_mosaic.version = 11 : i64} {
  func.func @_conv_block_kernel(%arg0: i32, %arg1: memref<1x8x640xf32, #tpu.memory_space<vmem>>, %arg2: memref<9x8x8xf32, #tpu.memory_space<vmem>>, %arg3: memref<9x8x8xf32, #tpu.memory_space<vmem>>, %arg4: memref<1x8x384xf32, #tpu.memory_space<vmem>>) attributes {dimension_semantics = [#tpu.dimension_semantics<parallel>], iteration_bounds = array<i64: 2>, scalar_prefetch = 0 : i64, scratch_operands = 0 : i64, tpu.core_type = #tpu.core_type<tc>, window_params = [{transform_indices = @transform_0, window_bounds = array<i64: 1, 8, 640>}, {pipeline_mode = #tpu.pipeline_mode<synchronous>, transform_indices = @transform_1, window_bounds = array<i64: 9, 8, 8>}, {pipeline_mode = #tpu.pipeline_mode<synchronous>, transform_indices = @transform_2, window_bounds = array<i64: 9, 8, 8>}, {transform_indices = @transform_3, window_bounds = array<i64: 1, 8, 384>}]} {
    %0 = tpu.iota {dimensions = array<i32: 1>} : vector<8x512xi32>
    %c19_i32 = arith.constant 19 : i32
    %1 = vector.broadcast %c19_i32 : i32 to vector<8x512xi32>
    %2 = arith.subi %0, %1 : vector<8x512xi32>
    %3 = arith.sitofp %2 : vector<8x512xi32> to vector<8x512xf32>
    %cst = arith.constant 5.000000e-01 : f32
    %4 = vector.broadcast %cst : f32 to vector<8x512xf32>
    %5 = arith.addf %3, %4 : vector<8x512xf32>
    %cst_0 = arith.constant 1.800000e+01 : f32
    %6 = vector.broadcast %cst_0 : f32 to vector<8x512xf32>
    %7 = arith.divf %5, %6 : vector<8x512xf32>
    %8 = math.floor %7 : vector<8x512xf32>
    %cst_1 = arith.constant 1.800000e+01 : f32
    %9 = vector.broadcast %cst_1 : f32 to vector<8x512xf32>
    %10 = arith.mulf %8, %9 : vector<8x512xf32>
    %11 = arith.subf %3, %10 : vector<8x512xf32>
    %cst_2 = arith.constant 0.000000e+00 : f32
    %12 = vector.broadcast %cst_2 : f32 to vector<8x512xf32>
    %13 = arith.cmpf oge, %3, %12 : vector<8x512xf32>
    %cst_3 = arith.constant 2.880000e+02 : f32
    %14 = vector.broadcast %cst_3 : f32 to vector<8x512xf32>
    %15 = arith.cmpf olt, %3, %14 : vector<8x512xf32>
    %16 = arith.andi %13, %15 : vector<8x512xi1>
    %cst_4 = arith.constant 1.600000e+01 : f32
    %17 = vector.broadcast %cst_4 : f32 to vector<8x512xf32>
    %18 = arith.cmpf olt, %11, %17 : vector<8x512xf32>
    %19 = arith.andi %16, %18 : vector<8x512xi1>
    %20 = arith.extui %19 : vector<8x512xi1> to vector<8x512xi32>
    %21 = arith.sitofp %20 : vector<8x512xi32> to vector<8x512xf32>
    %22 = tpu.iota {dimensions = array<i32: 1>} : vector<8x384xi32>
    %c0_i32 = arith.constant 0 : i32
    %23 = vector.broadcast %c0_i32 : i32 to vector<8x384xi32>
    %24 = arith.subi %22, %23 : vector<8x384xi32>
    %25 = arith.sitofp %24 : vector<8x384xi32> to vector<8x384xf32>
    %cst_5 = arith.constant 5.000000e-01 : f32
    %26 = vector.broadcast %cst_5 : f32 to vector<8x384xf32>
    %27 = arith.addf %25, %26 : vector<8x384xf32>
    %cst_6 = arith.constant 1.800000e+01 : f32
    %28 = vector.broadcast %cst_6 : f32 to vector<8x384xf32>
    %29 = arith.divf %27, %28 : vector<8x384xf32>
    %30 = math.floor %29 : vector<8x384xf32>
    %cst_7 = arith.constant 1.800000e+01 : f32
    %31 = vector.broadcast %cst_7 : f32 to vector<8x384xf32>
    %32 = arith.mulf %30, %31 : vector<8x384xf32>
    %33 = arith.subf %25, %32 : vector<8x384xf32>
    %cst_8 = arith.constant 0.000000e+00 : f32
    %34 = vector.broadcast %cst_8 : f32 to vector<8x384xf32>
    %35 = arith.cmpf oge, %25, %34 : vector<8x384xf32>
    %cst_9 = arith.constant 2.880000e+02 : f32
    %36 = vector.broadcast %cst_9 : f32 to vector<8x384xf32>
    %37 = arith.cmpf olt, %25, %36 : vector<8x384xf32>
    %38 = arith.andi %35, %37 : vector<8x384xi1>
    %cst_10 = arith.constant 1.600000e+01 : f32
    %39 = vector.broadcast %cst_10 : f32 to vector<8x384xf32>
    %40 = arith.cmpf olt, %33, %39 : vector<8x384xf32>
    %41 = arith.andi %38, %40 : vector<8x384xi1>
    %42 = arith.extui %41 : vector<8x384xi1> to vector<8x384xi32>
    %43 = arith.sitofp %42 : vector<8x384xi32> to vector<8x384xf32>
    %c0 = arith.constant 0 : index
    %c0_11 = arith.constant 0 : index
    %c0_12 = arith.constant 0 : index
    %44 = vector.load %arg2[%c0, %c0_11, %c0_12] : memref<9x8x8xf32, #tpu.memory_space<vmem>>, vector<9x8x8xf32>
    %c0_13 = arith.constant 0 : index
    %c0_14 = arith.constant 0 : index
    %c0_15 = arith.constant 0 : index
    %45 = vector.load %arg3[%c0_13, %c0_14, %c0_15] : memref<9x8x8xf32, #tpu.memory_space<vmem>>, vector<9x8x8xf32>
    %c0_16 = arith.constant 0 : index
    %c0_17 = arith.constant 0 : index
    %c0_18 = arith.constant 0 : index
    %46 = vector.load %arg1[%c0_16, %c0_17, %c0_18] : memref<1x8x640xf32, #tpu.memory_space<vmem>>, vector<1x8x640xf32>
    %47 = vector.shape_cast %46 : vector<1x8x640xf32> to vector<8x640xf32>
    %cst_19 = arith.constant 0.000000e+00 : f32
    %48 = vector.broadcast %cst_19 : f32 to vector<8x512xf32>
    %49 = vector.extract_strided_slice %44 {offsets = [0, 0, 0], sizes = [1, 8, 8], strides = [1, 1, 1]} : vector<9x8x8xf32> to vector<1x8x8xf32>
    %50 = vector.shape_cast %49 : vector<1x8x8xf32> to vector<8x8xf32>
    %51 = vector.extract_strided_slice %47 {offsets = [0, 0], sizes = [8, 512], strides = [1, 1]} : vector<8x640xf32> to vector<8x512xf32>
    %cst_20 = arith.constant dense<0.000000e+00> : vector<8x512xf32>
    %52 = tpu.matmul %50, %51, %cst_20 {dimension_numbers = #tpu.dot_dimension_numbers<[1], [0], [0], [1], [0, 0, 1, 1], [], []>} : vector<8x8xf32>, vector<8x512xf32>, vector<8x512xf32> -> vector<8x512xf32>
    %53 = arith.addf %48, %52 : vector<8x512xf32>
    %54 = vector.extract_strided_slice %44 {offsets = [1, 0, 0], sizes = [1, 8, 8], strides = [1, 1, 1]} : vector<9x8x8xf32> to vector<1x8x8xf32>
    %55 = vector.shape_cast %54 : vector<1x8x8xf32> to vector<8x8xf32>
    %56 = vector.extract_strided_slice %47 {offsets = [0, 1], sizes = [8, 512], strides = [1, 1]} : vector<8x640xf32> to vector<8x512xf32>
    %cst_21 = arith.constant dense<0.000000e+00> : vector<8x512xf32>
    %57 = tpu.matmul %55, %56, %cst_21 {dimension_numbers = #tpu.dot_dimension_numbers<[1], [0], [0], [1], [0, 0, 1, 1], [], []>} : vector<8x8xf32>, vector<8x512xf32>, vector<8x512xf32> -> vector<8x512xf32>
    %58 = arith.addf %53, %57 : vector<8x512xf32>
    %59 = vector.extract_strided_slice %44 {offsets = [2, 0, 0], sizes = [1, 8, 8], strides = [1, 1, 1]} : vector<9x8x8xf32> to vector<1x8x8xf32>
    %60 = vector.shape_cast %59 : vector<1x8x8xf32> to vector<8x8xf32>
    %61 = vector.extract_strided_slice %47 {offsets = [0, 2], sizes = [8, 512], strides = [1, 1]} : vector<8x640xf32> to vector<8x512xf32>
    %cst_22 = arith.constant dense<0.000000e+00> : vector<8x512xf32>
    %62 = tpu.matmul %60, %61, %cst_22 {dimension_numbers = #tpu.dot_dimension_numbers<[1], [0], [0], [1], [0, 0, 1, 1], [], []>} : vector<8x8xf32>, vector<8x512xf32>, vector<8x512xf32> -> vector<8x512xf32>
    %63 = arith.addf %58, %62 : vector<8x512xf32>
    %64 = vector.extract_strided_slice %44 {offsets = [3, 0, 0], sizes = [1, 8, 8], strides = [1, 1, 1]} : vector<9x8x8xf32> to vector<1x8x8xf32>
    %65 = vector.shape_cast %64 : vector<1x8x8xf32> to vector<8x8xf32>
    %66 = vector.extract_strided_slice %47 {offsets = [0, 18], sizes = [8, 512], strides = [1, 1]} : vector<8x640xf32> to vector<8x512xf32>
    %cst_23 = arith.constant dense<0.000000e+00> : vector<8x512xf32>
    %67 = tpu.matmul %65, %66, %cst_23 {dimension_numbers = #tpu.dot_dimension_numbers<[1], [0], [0], [1], [0, 0, 1, 1], [], []>} : vector<8x8xf32>, vector<8x512xf32>, vector<8x512xf32> -> vector<8x512xf32>
    %68 = arith.addf %63, %67 : vector<8x512xf32>
    %69 = vector.extract_strided_slice %44 {offsets = [4, 0, 0], sizes = [1, 8, 8], strides = [1, 1, 1]} : vector<9x8x8xf32> to vector<1x8x8xf32>
    %70 = vector.shape_cast %69 : vector<1x8x8xf32> to vector<8x8xf32>
    %71 = vector.extract_strided_slice %47 {offsets = [0, 19], sizes = [8, 512], strides = [1, 1]} : vector<8x640xf32> to vector<8x512xf32>
    %cst_24 = arith.constant dense<0.000000e+00> : vector<8x512xf32>
    %72 = tpu.matmul %70, %71, %cst_24 {dimension_numbers = #tpu.dot_dimension_numbers<[1], [0], [0], [1], [0, 0, 1, 1], [], []>} : vector<8x8xf32>, vector<8x512xf32>, vector<8x512xf32> -> vector<8x512xf32>
    %73 = arith.addf %68, %72 : vector<8x512xf32>
    %74 = vector.extract_strided_slice %44 {offsets = [5, 0, 0], sizes = [1, 8, 8], strides = [1, 1, 1]} : vector<9x8x8xf32> to vector<1x8x8xf32>
    %75 = vector.shape_cast %74 : vector<1x8x8xf32> to vector<8x8xf32>
    %76 = vector.extract_strided_slice %47 {offsets = [0, 20], sizes = [8, 512], strides = [1, 1]} : vector<8x640xf32> to vector<8x512xf32>
    %cst_25 = arith.constant dense<0.000000e+00> : vector<8x512xf32>
    %77 = tpu.matmul %75, %76, %cst_25 {dimension_numbers = #tpu.dot_dimension_numbers<[1], [0], [0], [1], [0, 0, 1, 1], [], []>} : vector<8x8xf32>, vector<8x512xf32>, vector<8x512xf32> -> vector<8x512xf32>
    %78 = arith.addf %73, %77 : vector<8x512xf32>
    %79 = vector.extract_strided_slice %44 {offsets = [6, 0, 0], sizes = [1, 8, 8], strides = [1, 1, 1]} : vector<9x8x8xf32> to vector<1x8x8xf32>
    %80 = vector.shape_cast %79 : vector<1x8x8xf32> to vector<8x8xf32>
    %81 = vector.extract_strided_slice %47 {offsets = [0, 36], sizes = [8, 512], strides = [1, 1]} : vector<8x640xf32> to vector<8x512xf32>
    %cst_26 = arith.constant dense<0.000000e+00> : vector<8x512xf32>
    %82 = tpu.matmul %80, %81, %cst_26 {dimension_numbers = #tpu.dot_dimension_numbers<[1], [0], [0], [1], [0, 0, 1, 1], [], []>} : vector<8x8xf32>, vector<8x512xf32>, vector<8x512xf32> -> vector<8x512xf32>
    %83 = arith.addf %78, %82 : vector<8x512xf32>
    %84 = vector.extract_strided_slice %44 {offsets = [7, 0, 0], sizes = [1, 8, 8], strides = [1, 1, 1]} : vector<9x8x8xf32> to vector<1x8x8xf32>
    %85 = vector.shape_cast %84 : vector<1x8x8xf32> to vector<8x8xf32>
    %86 = vector.extract_strided_slice %47 {offsets = [0, 37], sizes = [8, 512], strides = [1, 1]} : vector<8x640xf32> to vector<8x512xf32>
    %cst_27 = arith.constant dense<0.000000e+00> : vector<8x512xf32>
    %87 = tpu.matmul %85, %86, %cst_27 {dimension_numbers = #tpu.dot_dimension_numbers<[1], [0], [0], [1], [0, 0, 1, 1], [], []>} : vector<8x8xf32>, vector<8x512xf32>, vector<8x512xf32> -> vector<8x512xf32>
    %88 = arith.addf %83, %87 : vector<8x512xf32>
    %89 = vector.extract_strided_slice %44 {offsets = [8, 0, 0], sizes = [1, 8, 8], strides = [1, 1, 1]} : vector<9x8x8xf32> to vector<1x8x8xf32>
    %90 = vector.shape_cast %89 : vector<1x8x8xf32> to vector<8x8xf32>
    %91 = vector.extract_strided_slice %47 {offsets = [0, 38], sizes = [8, 512], strides = [1, 1]} : vector<8x640xf32> to vector<8x512xf32>
    %cst_28 = arith.constant dense<0.000000e+00> : vector<8x512xf32>
    %92 = tpu.matmul %90, %91, %cst_28 {dimension_numbers = #tpu.dot_dimension_numbers<[1], [0], [0], [1], [0, 0, 1, 1], [], []>} : vector<8x8xf32>, vector<8x512xf32>, vector<8x512xf32> -> vector<8x512xf32>
    %93 = arith.addf %88, %92 : vector<8x512xf32>
    %94 = arith.mulf %93, %21 : vector<8x512xf32>
    %cst_29 = arith.constant dense<0.000000e+00> : vector<8xf32>
    %95 = vector.multi_reduction <add>, %94, %cst_29 [1] : vector<8x512xf32> to vector<8xf32>
    %96 = vector.shape_cast %95 : vector<8xf32> to vector<8x1xf32>
    %cst_30 = arith.constant 3.906250e-03 : f32
    %97 = vector.broadcast %cst_30 : f32 to vector<8x1xf32>
    %98 = arith.mulf %96, %97 : vector<8x1xf32>
    %99 = arith.mulf %94, %93 : vector<8x512xf32>
    %cst_31 = arith.constant dense<0.000000e+00> : vector<8xf32>
    %100 = vector.multi_reduction <add>, %99, %cst_31 [1] : vector<8x512xf32> to vector<8xf32>
    %101 = vector.shape_cast %100 : vector<8xf32> to vector<8x1xf32>
    %cst_32 = arith.constant 3.906250e-03 : f32
    %102 = vector.broadcast %cst_32 : f32 to vector<8x1xf32>
    %103 = arith.mulf %101, %102 : vector<8x1xf32>
    %104 = arith.mulf %98, %98 : vector<8x1xf32>
    %105 = arith.subf %103, %104 : vector<8x1xf32>
    %cst_33 = arith.constant 0.000000e+00 : f32
    %106 = vector.broadcast %cst_33 : f32 to vector<8x1xf32>
    %107 = arith.maximumf %105, %106 : vector<8x1xf32>
    %108 = vector.broadcast %98 : vector<8x1xf32> to vector<8x512xf32>
    %109 = arith.subf %93, %108 : vector<8x512xf32>
    %cst_34 = arith.constant 9.99999974E-6 : f32
    %110 = vector.broadcast %cst_34 : f32 to vector<8x1xf32>
    %111 = arith.addf %107, %110 : vector<8x1xf32>
    %112 = math.rsqrt %111 : vector<8x1xf32>
    %113 = vector.broadcast %112 : vector<8x1xf32> to vector<8x512xf32>
    %114 = arith.mulf %109, %113 : vector<8x512xf32>
    %cst_35 = arith.constant 2.000000e-01 : f32
    %115 = vector.broadcast %cst_35 : f32 to vector<8x512xf32>
    %116 = arith.mulf %115, %114 : vector<8x512xf32>
    %117 = arith.maximumf %114, %116 : vector<8x512xf32>
    %118 = arith.mulf %117, %21 : vector<8x512xf32>
    %cst_36 = arith.constant 0.000000e+00 : f32
    %119 = vector.broadcast %cst_36 : f32 to vector<8x384xf32>
    %120 = vector.extract_strided_slice %45 {offsets = [0, 0, 0], sizes = [1, 8, 8], strides = [1, 1, 1]} : vector<9x8x8xf32> to vector<1x8x8xf32>
    %121 = vector.shape_cast %120 : vector<1x8x8xf32> to vector<8x8xf32>
    %122 = vector.extract_strided_slice %118 {offsets = [0, 0], sizes = [8, 384], strides = [1, 1]} : vector<8x512xf32> to vector<8x384xf32>
    %cst_37 = arith.constant dense<0.000000e+00> : vector<8x384xf32>
    %123 = tpu.matmul %121, %122, %cst_37 {dimension_numbers = #tpu.dot_dimension_numbers<[1], [0], [0], [1], [0, 0, 1, 1], [], []>} : vector<8x8xf32>, vector<8x384xf32>, vector<8x384xf32> -> vector<8x384xf32>
    %124 = arith.addf %119, %123 : vector<8x384xf32>
    %125 = vector.extract_strided_slice %45 {offsets = [1, 0, 0], sizes = [1, 8, 8], strides = [1, 1, 1]} : vector<9x8x8xf32> to vector<1x8x8xf32>
    %126 = vector.shape_cast %125 : vector<1x8x8xf32> to vector<8x8xf32>
    %127 = vector.extract_strided_slice %118 {offsets = [0, 1], sizes = [8, 384], strides = [1, 1]} : vector<8x512xf32> to vector<8x384xf32>
    %cst_38 = arith.constant dense<0.000000e+00> : vector<8x384xf32>
    %128 = tpu.matmul %126, %127, %cst_38 {dimension_numbers = #tpu.dot_dimension_numbers<[1], [0], [0], [1], [0, 0, 1, 1], [], []>} : vector<8x8xf32>, vector<8x384xf32>, vector<8x384xf32> -> vector<8x384xf32>
    %129 = arith.addf %124, %128 : vector<8x384xf32>
    %130 = vector.extract_strided_slice %45 {offsets = [2, 0, 0], sizes = [1, 8, 8], strides = [1, 1, 1]} : vector<9x8x8xf32> to vector<1x8x8xf32>
    %131 = vector.shape_cast %130 : vector<1x8x8xf32> to vector<8x8xf32>
    %132 = vector.extract_strided_slice %118 {offsets = [0, 2], sizes = [8, 384], strides = [1, 1]} : vector<8x512xf32> to vector<8x384xf32>
    %cst_39 = arith.constant dense<0.000000e+00> : vector<8x384xf32>
    %133 = tpu.matmul %131, %132, %cst_39 {dimension_numbers = #tpu.dot_dimension_numbers<[1], [0], [0], [1], [0, 0, 1, 1], [], []>} : vector<8x8xf32>, vector<8x384xf32>, vector<8x384xf32> -> vector<8x384xf32>
    %134 = arith.addf %129, %133 : vector<8x384xf32>
    %135 = vector.extract_strided_slice %45 {offsets = [3, 0, 0], sizes = [1, 8, 8], strides = [1, 1, 1]} : vector<9x8x8xf32> to vector<1x8x8xf32>
    %136 = vector.shape_cast %135 : vector<1x8x8xf32> to vector<8x8xf32>
    %137 = vector.extract_strided_slice %118 {offsets = [0, 18], sizes = [8, 384], strides = [1, 1]} : vector<8x512xf32> to vector<8x384xf32>
    %cst_40 = arith.constant dense<0.000000e+00> : vector<8x384xf32>
    %138 = tpu.matmul %136, %137, %cst_40 {dimension_numbers = #tpu.dot_dimension_numbers<[1], [0], [0], [1], [0, 0, 1, 1], [], []>} : vector<8x8xf32>, vector<8x384xf32>, vector<8x384xf32> -> vector<8x384xf32>
    %139 = arith.addf %134, %138 : vector<8x384xf32>
    %140 = vector.extract_strided_slice %45 {offsets = [4, 0, 0], sizes = [1, 8, 8], strides = [1, 1, 1]} : vector<9x8x8xf32> to vector<1x8x8xf32>
    %141 = vector.shape_cast %140 : vector<1x8x8xf32> to vector<8x8xf32>
    %142 = vector.extract_strided_slice %118 {offsets = [0, 19], sizes = [8, 384], strides = [1, 1]} : vector<8x512xf32> to vector<8x384xf32>
    %cst_41 = arith.constant dense<0.000000e+00> : vector<8x384xf32>
    %143 = tpu.matmul %141, %142, %cst_41 {dimension_numbers = #tpu.dot_dimension_numbers<[1], [0], [0], [1], [0, 0, 1, 1], [], []>} : vector<8x8xf32>, vector<8x384xf32>, vector<8x384xf32> -> vector<8x384xf32>
    %144 = arith.addf %139, %143 : vector<8x384xf32>
    %145 = vector.extract_strided_slice %45 {offsets = [5, 0, 0], sizes = [1, 8, 8], strides = [1, 1, 1]} : vector<9x8x8xf32> to vector<1x8x8xf32>
    %146 = vector.shape_cast %145 : vector<1x8x8xf32> to vector<8x8xf32>
    %147 = vector.extract_strided_slice %118 {offsets = [0, 20], sizes = [8, 384], strides = [1, 1]} : vector<8x512xf32> to vector<8x384xf32>
    %cst_42 = arith.constant dense<0.000000e+00> : vector<8x384xf32>
    %148 = tpu.matmul %146, %147, %cst_42 {dimension_numbers = #tpu.dot_dimension_numbers<[1], [0], [0], [1], [0, 0, 1, 1], [], []>} : vector<8x8xf32>, vector<8x384xf32>, vector<8x384xf32> -> vector<8x384xf32>
    %149 = arith.addf %144, %148 : vector<8x384xf32>
    %150 = vector.extract_strided_slice %45 {offsets = [6, 0, 0], sizes = [1, 8, 8], strides = [1, 1, 1]} : vector<9x8x8xf32> to vector<1x8x8xf32>
    %151 = vector.shape_cast %150 : vector<1x8x8xf32> to vector<8x8xf32>
    %152 = vector.extract_strided_slice %118 {offsets = [0, 36], sizes = [8, 384], strides = [1, 1]} : vector<8x512xf32> to vector<8x384xf32>
    %cst_43 = arith.constant dense<0.000000e+00> : vector<8x384xf32>
    %153 = tpu.matmul %151, %152, %cst_43 {dimension_numbers = #tpu.dot_dimension_numbers<[1], [0], [0], [1], [0, 0, 1, 1], [], []>} : vector<8x8xf32>, vector<8x384xf32>, vector<8x384xf32> -> vector<8x384xf32>
    %154 = arith.addf %149, %153 : vector<8x384xf32>
    %155 = vector.extract_strided_slice %45 {offsets = [7, 0, 0], sizes = [1, 8, 8], strides = [1, 1, 1]} : vector<9x8x8xf32> to vector<1x8x8xf32>
    %156 = vector.shape_cast %155 : vector<1x8x8xf32> to vector<8x8xf32>
    %157 = vector.extract_strided_slice %118 {offsets = [0, 37], sizes = [8, 384], strides = [1, 1]} : vector<8x512xf32> to vector<8x384xf32>
    %cst_44 = arith.constant dense<0.000000e+00> : vector<8x384xf32>
    %158 = tpu.matmul %156, %157, %cst_44 {dimension_numbers = #tpu.dot_dimension_numbers<[1], [0], [0], [1], [0, 0, 1, 1], [], []>} : vector<8x8xf32>, vector<8x384xf32>, vector<8x384xf32> -> vector<8x384xf32>
    %159 = arith.addf %154, %158 : vector<8x384xf32>
    %160 = vector.extract_strided_slice %45 {offsets = [8, 0, 0], sizes = [1, 8, 8], strides = [1, 1, 1]} : vector<9x8x8xf32> to vector<1x8x8xf32>
    %161 = vector.shape_cast %160 : vector<1x8x8xf32> to vector<8x8xf32>
    %162 = vector.extract_strided_slice %118 {offsets = [0, 38], sizes = [8, 384], strides = [1, 1]} : vector<8x512xf32> to vector<8x384xf32>
    %cst_45 = arith.constant dense<0.000000e+00> : vector<8x384xf32>
    %163 = tpu.matmul %161, %162, %cst_45 {dimension_numbers = #tpu.dot_dimension_numbers<[1], [0], [0], [1], [0, 0, 1, 1], [], []>} : vector<8x8xf32>, vector<8x384xf32>, vector<8x384xf32> -> vector<8x384xf32>
    %164 = arith.addf %159, %163 : vector<8x384xf32>
    %165 = arith.mulf %164, %43 : vector<8x384xf32>
    %cst_46 = arith.constant dense<0.000000e+00> : vector<8xf32>
    %166 = vector.multi_reduction <add>, %165, %cst_46 [1] : vector<8x384xf32> to vector<8xf32>
    %167 = vector.shape_cast %166 : vector<8xf32> to vector<8x1xf32>
    %cst_47 = arith.constant 3.906250e-03 : f32
    %168 = vector.broadcast %cst_47 : f32 to vector<8x1xf32>
    %169 = arith.mulf %167, %168 : vector<8x1xf32>
    %170 = arith.mulf %165, %164 : vector<8x384xf32>
    %cst_48 = arith.constant dense<0.000000e+00> : vector<8xf32>
    %171 = vector.multi_reduction <add>, %170, %cst_48 [1] : vector<8x384xf32> to vector<8xf32>
    %172 = vector.shape_cast %171 : vector<8xf32> to vector<8x1xf32>
    %cst_49 = arith.constant 3.906250e-03 : f32
    %173 = vector.broadcast %cst_49 : f32 to vector<8x1xf32>
    %174 = arith.mulf %172, %173 : vector<8x1xf32>
    %175 = arith.mulf %169, %169 : vector<8x1xf32>
    %176 = arith.subf %174, %175 : vector<8x1xf32>
    %cst_50 = arith.constant 0.000000e+00 : f32
    %177 = vector.broadcast %cst_50 : f32 to vector<8x1xf32>
    %178 = arith.maximumf %176, %177 : vector<8x1xf32>
    %179 = vector.broadcast %169 : vector<8x1xf32> to vector<8x384xf32>
    %180 = arith.subf %164, %179 : vector<8x384xf32>
    %cst_51 = arith.constant 9.99999974E-6 : f32
    %181 = vector.broadcast %cst_51 : f32 to vector<8x1xf32>
    %182 = arith.addf %178, %181 : vector<8x1xf32>
    %183 = math.rsqrt %182 : vector<8x1xf32>
    %184 = vector.broadcast %183 : vector<8x1xf32> to vector<8x384xf32>
    %185 = arith.mulf %180, %184 : vector<8x384xf32>
    %cst_52 = arith.constant 2.000000e-01 : f32
    %186 = vector.broadcast %cst_52 : f32 to vector<8x384xf32>
    %187 = arith.mulf %186, %185 : vector<8x384xf32>
    %188 = arith.maximumf %185, %187 : vector<8x384xf32>
    %c0_53 = arith.constant 0 : index
    %c0_54 = arith.constant 0 : index
    %c0_55 = arith.constant 0 : index
    %189 = vector.load %arg4[%c0_53, %c0_54, %c0_55] : memref<1x8x384xf32, #tpu.memory_space<vmem>>, vector<1x8x384xf32>
    %190 = vector.shape_cast %189 : vector<1x8x384xf32> to vector<8x384xf32>
    %191 = vector.shape_cast %188 : vector<8x384xf32> to vector<1x8x384xf32>
    tpu.vector_store %arg4[%c0_53, %c0_54, %c0_55], %191 {strides = array<i32>} : memref<1x8x384xf32, #tpu.memory_space<vmem>>, vector<1x8x384xf32>,
    return
  }
  func.func @transform_0(%arg0: i32) -> (i32, i32, i32) {
    %c0_i32 = arith.constant 0 : i32
    %c0_i32_0 = arith.constant 0 : i32
    %c0_i32_1 = arith.constant 0 : i32
    return %arg0, %c0_i32, %c0_i32_0 : i32, i32, i32
  }
  func.func @transform_1(%arg0: i32) -> (i32, i32, i32) {
    %c0_i32 = arith.constant 0 : i32
    %c0_i32_0 = arith.constant 0 : i32
    %c0_i32_1 = arith.constant 0 : i32
    %c0_i32_2 = arith.constant 0 : i32
    return %c0_i32, %c0_i32_0, %c0_i32_1 : i32, i32, i32
  }
  func.func @transform_2(%arg0: i32) -> (i32, i32, i32) {
    %c0_i32 = arith.constant 0 : i32
    %c0_i32_0 = arith.constant 0 : i32
    %c0_i32_1 = arith.constant 0 : i32
    %c0_i32_2 = arith.constant 0 : i32
    return %c0_i32, %c0_i32_0, %c0_i32_1 : i32, i32, i32
  }
  func.func @transform_3(%arg0: i32) -> (i32, i32, i32) {
    %c0_i32 = arith.constant 0 : i32
    %c0_i32_0 = arith.constant 0 : i32
    %c0_i32_1 = arith.constant 0 : i32
    return %arg0, %c0_i32, %c0_i32_0 : i32, i32, i32
  }
}

</mosaic_0001>

<bundles_post_ra>
// kernel: conv_block_forward.1
= control target key start
LH: loop header
LB: loop body
LE: loop exit
PB: predicated region body
PF: predicated region fallthrough
CT: control target
= control target key end

     0   :  { %s3600_s12 = smov 0   ;;  %s3977_s0 = inlined_call_operand.vmem [shape: f32[2,8,640], index: 0, kind: input, shape index: {}]   ;;  %s3978_s1 = inlined_call_operand.vmem [shape: f32[9,8,8], index: 1, kind: input, shape index: {}]   ;;  %s3979_s2 = inlined_call_operand.vmem [shape: f32[9,8,8], index: 2, kind: input, shape index: {}]   ;;  %s3980_s3 = inlined_call_operand.vmem [shape: f32[2,8,384], index: 3, kind: output, shape index: {}]  }
   0x1 LB: > { %s3355_s13 = sadd.s32 4294967295, %s3568_s12   ;;  %p3359_p0 = scmp.ge.s32.totalorder %s3568_s12, 1  ;;  %s3568_s12 = sphi %s3600_s12, %s13_s12  }
   0x2   : > { %p137_p1 = scmp.lt.s32.totalorder %s3568_s12, 3 }
   0x4   : > { %p138_p2 = pnand %p3359_p0, %p137_p1 }
   0x5   : > { %p161_p3 = scmp.lt.s32.totalorder (!%p138_p2), %s3355_s13, 1  ;;  %v3570_v0 = vmov (!%p138_p2), 0.0   ;;  %s3571_s18 = smov (!%p138_p2), 127   ;;  %vm3989_vm0 = vcmask (!%p138_p2), 1039360   ;;  %v273_v11 = vld [vmem:[%s3978_s1 + $0x8] sm:$0xff] (!%p138_p2)  ;;  %vm3988_vm1 = vcmask (!%p138_p2), 64512  }
   0x6   : > { %141 = sbr.rel (%p138_p2) target bundleno = 1176 (0x498), region = 32  ;;  %387 = vmatprep.mubr.f32.mxu0 (!%p138_p2), %v3570_v0  ;;  %458 = vmatprep.mubr.f32.mxu1 (!%p138_p2), %v3570_v0  ;;  %s3572_s19 = smov (!%p138_p2), 126   ;;  %vm3987_vm2 = vcmask (!%p138_p2), 1031168   ;;  %v272_v20 = vld [vmem:[%s3978_s1] sm:$0xff] (!%p138_p2)  ;;  %vm3986_vm3 = vcmask (!%p138_p2), 900096   ;;  %v274_v29 = vld [vmem:[%s3978_s1 + $0x10] sm:$0xff] (!%p138_p2) }
   0x7   : > { %s3573_s20 = smov (!%p138_p2), 110   ;;  %s3574_s21 = smov (!%p138_p2), 109   ;;  %v275_v36 = vld [vmem:[%s3978_s1 + $0x18] sm:$0xff] (!%p138_p2)  ;;  %vm3985_vm4 = vcmask (!%p138_p2), 891904   ;;  %v276_v46 = vld [vmem:[%s3978_s1 + $0x20] sm:$0xff] (!%p138_p2)  ;;  %vm3984_vm5 = vcmask (!%p138_p2), 883712  }
   0x8   : > { %s3575_s22 = smov (!%p138_p2), 108   ;;  %s3576_s23 = smov (!%p138_p2), 92   ;;  %v277_v53 = vld [vmem:[%s3978_s1 + $0x28] sm:$0xff] (!%p138_p2)  ;;  %vm3983_vm6 = vcmask (!%p138_p2), 752640   ;;  %v278_v62 = vld [vmem:[%s3978_s1 + $0x30] sm:$0xff] (!%p138_p2)  ;;  %vm3982_vm7 = vcmask (!%p138_p2), 744448  }
   0x9   : > { %s3577_s24 = smov (!%p138_p2), 91   ;;  %s3578_s25 = smov (!%p138_p2), 90   ;;  %vm3981_vm8 = vcmask (!%p138_p2), 736256  }
   0xd   : > { %s4037_s13 = smov (!%p161_p3, %s3355_s13), 1 }
   0xe   : > { %s3538_s14 = smul.u32 40, %s4037_s13 }
   0xf   : > { %s3539_s10 = smul.u32 24, %s4037_s13 }
  0x10   : > { %s165_s17 = scalar_lea.vmem %s3977_s0, %s3538_s14 }
  0x11   : > { %v3616_v1 = vld [vmem:[%s165_s17 + $0x8] sm:$0xff]  ;;  %v3618_v2 = vld [vmem:[%s165_s17] sm:$0xff]  ;;  %v3624_v3 = vld [vmem:[%s165_s17 + $0x10] sm:$0xff]  ;;  %s170_s15 = scalar_lea.vmem %s3980_s3, %s3539_s10 }
  0x12   : > { %302 = vrot.lane.b32.xlu0 %v3616_v1, %s3571_s18  ;;  %300 = vrot.lane.b32.xlu1 %v3618_v2, %s3571_s18  ;;  %v3626_v4 = vld [vmem:[%s165_s17 + $0x18] sm:$0xff]  ;;  %v294_v5 = vld [vmem:[%s165_s17 + $0x20] sm:$0xff] }
  0x16   : > { %304 = vrot.lane.b32.xlu0 %v3624_v3, %s3571_s18  ;;  %306 = vrot.lane.b32.xlu1 %v3626_v4, %s3571_s18 }
  0x1a   : > { %308 = vrot.lane.b32.xlu0 %v294_v5, %s3571_s18  ;;  %612 = vrot.lane.b32.xlu1 %v3616_v1, %s3572_s19 }
  0x1e   : > { %614 = vrot.lane.b32.xlu0 %v3624_v3, %s3572_s19  ;;  %610 = vrot.lane.b32.xlu1 %v3618_v2, %s3572_s19 }
  0x22   : > { %616 = vrot.lane.b32.xlu0 %v3626_v4, %s3572_s19  ;;  %618 = vrot.lane.b32.xlu1 %v294_v5, %s3572_s19 }
  0x26   : > { %780 = vrot.lane.b32.xlu0 %v3616_v1, %s3573_s20  ;;  %782 = vrot.lane.b32.xlu1 %v3624_v3, %s3573_s20 }
  0x2a   : > { %778 = vrot.lane.b32.xlu0 %v3618_v2, %s3573_s20  ;;  %784 = vrot.lane.b32.xlu1 %v3626_v4, %s3573_s20 }
  0x2e   : > { %786 = vrot.lane.b32.xlu0 %v294_v5, %s3573_s20  ;;  %948 = vrot.lane.b32.xlu1 %v3616_v1, %s3574_s21 }
  0x32   : > { %950 = vrot.lane.b32.xlu0 %v3624_v3, %s3574_s21  ;;  %946 = vrot.lane.b32.xlu1 %v3618_v2, %s3574_s21 }
  0x36   : > { %952 = vrot.lane.b32.xlu0 %v3626_v4, %s3574_s21  ;;  %954 = vrot.lane.b32.xlu1 %v294_v5, %s3574_s21 }
  0x3a   : > { %1116 = vrot.lane.b32.xlu0 %v3616_v1, %s3575_s22  ;;  %1118 = vrot.lane.b32.xlu1 %v3624_v3, %s3575_s22 }
  0x3e   : > { %1114 = vrot.lane.b32.xlu0 %v3618_v2, %s3575_s22  ;;  %1120 = vrot.lane.b32.xlu1 %v3626_v4, %s3575_s22 }
  0x42   : > { %1122 = vrot.lane.b32.xlu0 %v294_v5, %s3575_s22  ;;  %1284 = vrot.lane.b32.xlu1 %v3616_v1, %s3576_s23 }
  0x46   : > { %1286 = vrot.lane.b32.xlu0 %v3624_v3, %s3576_s23  ;;  %1282 = vrot.lane.b32.xlu1 %v3618_v2, %s3576_s23 }
  0x4a   : > { %1288 = vrot.lane.b32.xlu0 %v3626_v4, %s3576_s23  ;;  %1290 = vrot.lane.b32.xlu1 %v294_v5, %s3576_s23 }
  0x4e   : > { %1452 = vrot.lane.b32.xlu0 %v3616_v1, %s3577_s24  ;;  %1454 = vrot.lane.b32.xlu1 %v3624_v3, %s3577_s24 }
  0x52   : > { %1450 = vrot.lane.b32.xlu0 %v3618_v2, %s3577_s24  ;;  %1456 = vrot.lane.b32.xlu1 %v3626_v4, %s3577_s24 }
  0x56   : > { %1458 = vrot.lane.b32.xlu0 %v294_v5, %s3577_s24  ;;  %1620 = vrot.lane.b32.xlu1 %v3616_v1, %s3578_s25 }
  0x5a   : > { %1622 = vrot.lane.b32.xlu0 %v3624_v3, %s3578_s25  ;;  %1618 = vrot.lane.b32.xlu1 %v3618_v2, %s3578_s25 }
  0x5e   : > { %1624 = vrot.lane.b32.xlu0 %v3626_v4, %s3578_s25  ;;  %1626 = vrot.lane.b32.xlu1 %v294_v5, %s3578_s25 }
  0x84   : > { %v303_v6 = vpop.permute.xlu0 %302  ;;  %v301_v7 = vpop.permute.xlu1 %300 }
  0x85   : > { %v311_v12 = vsel %vm3989_vm0, %v301_v7, %v303_v6 }
  0x88   : > { %v305_v8 = vpop.permute.xlu0 %304  ;;  %v307_v9 = vpop.permute.xlu1 %306 }
  0x89   : > { %v312_v10 = vsel %vm3989_vm0, %v303_v6, %v305_v8  ;;  %v313_v16 = vsel %vm3989_vm0, %v305_v8, %v307_v9 }
  0x8a   : > { %323 = vmatprep.subr.mxu0 %v312_v10 }
  0x8b   : > { %324 = vmatpush1.msra.mxu0 %v311_v12 }
  0x8c   : > { %v309_v13 = vpop.permute.xlu0 %308  ;;  %3373 = vmatmul.mubr.msk.f32.vlgmr.msra.gmra.mrb[0].mxu0 %vm3988_vm1, %v273_v11  ;;  %v613_v14 = vpop.permute.xlu1 %612  ;;  %468 = vmatprep.subr.mxu0 %v3616_v1 }
  0x8d   : > { %v314_v15 = vsel %vm3989_vm0, %v307_v9, %v309_v13  ;;  %469 = vmatpush1.msra.mxu0 %v3618_v2  ;;  %532 = vmatprep.mubr.f32.mxu0 %v3570_v0  ;;  %v279_v9 = vld [vmem:[%s3978_s1 + $0x38] sm:$0xff] }
  0x8e   : > { %394 = vmatprep.subr.mxu1 %v314_v15 }
  0x8f   : > { %395 = vmatpush1.msra.mxu1 %v313_v16 }
  0x90   : > { %v615_v17 = vpop.permute.xlu0 %614  ;;  %3374 = vmatmul.mubr.msk.f32.vlgmr.msra.gmra.mrb[0].mxu1 %vm3988_vm1, %v273_v11  ;;  %v611_v18 = vpop.permute.xlu1 %610  ;;  %539 = vmatprep.subr.mxu1 %v3626_v4 }
  0x91   : > { %v622_v19 = vsel %vm3987_vm2, %v613_v14, %v615_v17  ;;  %540 = vmatpush1.msra.mxu1 %v3624_v3  ;;  %603 = vmatprep.mubr.f32.mxu1 %v3570_v0  ;;  %v621_v21 = vsel %vm3987_vm2, %v611_v18, %v613_v14 }
  0x92   : > { %632 = vmatprep.subr.mxu0 %v622_v19  ;;  %v280_v19 = vld [vmem:[%s3978_s1 + $0x40] sm:$0xff] }
  0x94   : > { %v617_v22 = vpop.permute.xlu0 %616  ;;  %3375 = vmatmul.mubr.msk.f32.vlgmr.msra.gmra.mrb[0].mxu0 %vm3988_vm1, %v272_v20  ;;  %v619_v23 = vpop.permute.xlu1 %618 }
  0x95   : > { %633 = vmatpush1.msra.mxu0 %v621_v21  ;;  %v624_v24 = vsel %vm3987_vm2, %v617_v22, %v619_v23  ;;  %696 = vmatprep.mubr.f32.mxu0 %v3570_v0  ;;  %v623_v25 = vsel %vm3987_vm2, %v615_v17, %v617_v22 }
  0x96   : > { %703 = vmatprep.subr.mxu1 %v624_v24  ;;  %v171_v24 = vlaneseq }
  0x98   : > { %v781_v26 = vpop.permute.xlu0 %780  ;;  %3376 = vmatmul.mubr.msk.f32.vlgmr.msra.gmra.mrb[0].mxu1 %vm3988_vm1, %v272_v20  ;;  %v783_v27 = vpop.permute.xlu1 %782 }
  0x99   : > { %704 = vmatpush1.msra.mxu1 %v623_v25  ;;  %v790_v28 = vsel %vm3986_vm3, %v781_v26, %v783_v27  ;;  %767 = vmatprep.mubr.f32.mxu1 %v3570_v0  ;;  %v3795_v25 = vand.u32 127, %v171_v24 }
  0x9a   : > { %800 = vmatprep.subr.mxu0 %v790_v28 }
  0x9c   : > { %v779_v30 = vpop.permute.xlu0 %778  ;;  %v785_v31 = vpop.permute.xlu1 %784  ;;  %3377 = vmatmul.mubr.msk.f32.vlgmr.msra.gmra.mrb[0].mxu0 %vm3988_vm1, %v274_v29 }
  0x9d   : > { %v789_v32 = vsel %vm3986_vm3, %v779_v30, %v781_v26  ;;  %864 = vmatprep.mubr.f32.mxu0 %v3570_v0  ;;  %v791_v37 = vsel %vm3986_vm3, %v783_v27, %v785_v31  ;;  %v3798_v26 = vadd.s32 128, %v3795_v25  ;;  %v3362_v27 = vadd.s32 4294967277, %v3795_v25 }
  0x9e   : > { %801 = vmatpush1.msra.mxu0 %v789_v32  ;;  %v175_v30 = vadd.s32 384, %v3795_v25 }
  0x9f   : > { %v3363_v28 = vadd.s32 4294967277, %v3798_v26 }
  0xa0   : > { %v787_v33 = vpop.permute.xlu0 %786  ;;  %v949_v34 = vpop.permute.xlu1 %948  ;;  %3378 = vmatmul.mubr.msk.f32.vlgmr.msra.gmra.mrb[0].mxu1 %vm3988_vm1, %v274_v29  ;;  %v3803_v29 = vadd.s32 256, %v3795_v25 }
  0xa1   : > { %v792_v35 = vsel %vm3986_vm3, %v785_v31, %v787_v33  ;;  %935 = vmatprep.mubr.f32.mxu1 %v3570_v0  ;;  %v180_v31 = vcvt.s32.f32 %v3362_v27  ;;  %v181_v32 = vcvt.s32.f32 %v3363_v28 }
  0xa2   : > { %871 = vmatprep.subr.mxu1 %v792_v35  ;;  %v3364_v33 = vadd.s32 4294967277, %v3803_v29 }
  0xa3   : > { %872 = vmatpush1.msra.mxu1 %v791_v37  ;;  %v184_v35 = vadd.f32 0.5, %v180_v31  ;;  %vm205_vm9 = vcmp.ge.f32.partialorder %v180_v31, 0.0  ;;  %vm209_vm10 = vcmp.lt.f32.partialorder %v180_v31, 288.0  ;;  %vm206_vm11 = vcmp.ge.f32.partialorder %v181_v32, 0.0 }
  0xa4   : > { %v951_v38 = vpop.permute.xlu0 %950  ;;  %v947_v39 = vpop.permute.xlu1 %946  ;;  %3379 = vmatmul.mubr.msk.f32.vlgmr.msra.gmra.mrb[0].mxu0 %vm3988_vm1, %v275_v36  ;;  %v182_v37 = vcvt.s32.f32 %v3364_v33  ;;  %vm210_vm12 = vcmp.lt.f32.partialorder %v181_v32, 288.0  ;;  %vm3807_vm13 = vmand %vm205_vm9, %vm209_vm10 }
  0xa5   : > { %v957_v40 = vsel %vm3985_vm4, %v947_v39, %v949_v34  ;;  %v958_v41 = vsel %vm3985_vm4, %v949_v34, %v951_v38  ;;  %1032 = vmatprep.mubr.f32.mxu0 %v3570_v0  ;;  %v3365_v34 = vadd.s32 4294967277, %v175_v30  ;;  %v189_v39 = vmul.f32 0.055555556, %v184_v35  ;;  %vm3815_vm15 = vmand %vm206_vm11, %vm210_vm12 }
  0xa6   : > { %968 = vmatprep.subr.mxu0 %v958_v41  ;;  %v186_v41 = vadd.f32 0.5, %v182_v37 }
  0xa7   : > { %969 = vmatpush1.msra.mxu0 %v957_v40 }
  0xa8   : > { %v953_v42 = vpop.permute.xlu0 %952  ;;  %v955_v43 = vpop.permute.xlu1 %954  ;;  %3380 = vmatmul.mubr.msk.f32.vlgmr.msra.gmra.mrb[0].mxu1 %vm3988_vm1, %v275_v36  ;;  %v185_v36 = vadd.f32 0.5, %v181_v32 }
  0xa9   : > { %v959_v44 = vsel %vm3985_vm4, %v951_v38, %v953_v42  ;;  %v960_v45 = vsel %vm3985_vm4, %v953_v42, %v955_v43  ;;  %1103 = vmatprep.mubr.f32.mxu1 %v3570_v0  ;;  %v183_v38 = vcvt.s32.f32 %v3365_v34  ;;  %v193_v43 = vfloor.f32 %v189_v39 }
  0xaa   : > { %1039 = vmatprep.subr.mxu1 %v960_v45  ;;  %v190_v40 = vmul.f32 0.055555556, %v185_v36  ;;  %v191_v45 = vmul.f32 0.055555556, %v186_v41 }
  0xab   : > { %1040 = vmatpush1.msra.mxu1 %v959_v44  ;;  %v187_v42 = vadd.f32 0.5, %v183_v38  ;;  %vm208_vm10 = vcmp.ge.f32.partialorder %v183_v38, 0.0 }
  0xac   : > { %v1117_v47 = vpop.permute.xlu0 %1116  ;;  %v1119_v48 = vpop.permute.xlu1 %1118  ;;  %3381 = vmatmul.mubr.msk.f32.vlgmr.msra.gmra.mrb[0].mxu0 %vm3988_vm1, %v276_v46  ;;  %v194_v44 = vfloor.f32 %v190_v40 }
  0xad   : > { %v1126_v49 = vsel %vm3984_vm5, %v1117_v47, %v1119_v48  ;;  %1200 = vmatprep.mubr.f32.mxu0 %v3570_v0 }
  0xae   : > { %1136 = vmatprep.subr.mxu0 %v1126_v49  ;;  %v195_v49 = vfloor.f32 %v191_v45 }
  0xb0   : > { %v1115_v50 = vpop.permute.xlu0 %1114  ;;  %v1121_v51 = vpop.permute.xlu1 %1120  ;;  %3382 = vmatmul.mubr.msk.f32.vlgmr.msra.gmra.mrb[0].mxu1 %vm3988_vm1, %v276_v46  ;;  %v192_v46 = vmul.f32 0.055555556, %v187_v42 }
  0xb1   : > { %v1125_v52 = vsel %vm3984_vm5, %v1115_v50, %v1117_v47  ;;  %1271 = vmatprep.mubr.f32.mxu1 %v3570_v0  ;;  %v1127_v57 = vsel %vm3984_vm5, %v1119_v48, %v1121_v51  ;;  %v197_v47 = vmul.f32 18.0, %v193_v43  ;;  %v198_v48 = vmul.f32 18.0, %v194_v44 }
  0xb2   : > { %1137 = vmatpush1.msra.mxu0 %v1125_v52  ;;  %v196_v50 = vfloor.f32 %v192_v46 }
  0xb3   : > { %v202_v52 = vsub.f32 %v181_v32, %v198_v48 }
  0xb4   : > { %v1123_v54 = vpop.permute.xlu0 %1122  ;;  %v1285_v55 = vpop.permute.xlu1 %1284  ;;  %3383 = vmatmul.mubr.msk.f32.vlgmr.msra.gmra.mrb[0].mxu0 %vm3988_vm1, %v277_v53 }
  0xb5   : > { %v1128_v56 = vsel %vm3984_vm5, %v1121_v51, %v1123_v54  ;;  %1368 = vmatprep.mubr.f32.mxu0 %v3570_v0  ;;  %v201_v51 = vsub.f32 %v180_v31, %v197_v47  ;;  %v200_v54 = vmul.f32 18.0, %v196_v50  ;;  %vm212_vm5 = vcmp.lt.f32.partialorder %v183_v38, 288.0 }
  0xb6   : > { %1207 = vmatprep.subr.mxu1 %v1128_v56  ;;  %vm216_vm12 = vmand %vm208_vm10, %vm212_vm5  ;;  %v282_v56 = vld [vmem:[%s3979_s2 + $0x8] sm:$0xff] }
  0xb7   : > { %1208 = vmatpush1.msra.mxu1 %v1127_v57  ;;  %vm3811_vm14 = vcmp.lt.f32.partialorder %v201_v51, 16.0 }
  0xb8   : > { %v1287_v58 = vpop.permute.xlu0 %1286  ;;  %v1283_v59 = vpop.permute.xlu1 %1282  ;;  %3384 = vmatmul.mubr.msk.f32.vlgmr.msra.gmra.mrb[0].mxu1 %vm3988_vm1, %v277_v53  ;;  %v199_v53 = vmul.f32 18.0, %v195_v49  ;;  %vm221_vm9 = vmand %vm3807_vm13, %vm3811_vm14 }
  0xb9   : > { %v1293_v60 = vsel %vm3983_vm6, %v1283_v59, %v1285_v55  ;;  %v1294_v61 = vsel %vm3983_vm6, %v1285_v55, %v1287_v58  ;;  %1439 = vmatprep.mubr.f32.mxu1 %v3570_v0  ;;  %v204_v59 = vsub.f32 %v183_v38, %v200_v54 }
  0xba   : > { %1304 = vmatprep.subr.mxu0 %v1294_v61 }
  0xbb   : > { %1305 = vmatpush1.msra.mxu0 %v1293_v60  ;;  %vm220_vm2 = vcmp.lt.f32.partialorder %v204_v59, 16.0  ;;  %v3366_v60 = vsel %vm221_vm9, 1.0, %v3570_v0 }
  0xbc   : > { %v1289_v63 = vpop.permute.xlu0 %1288  ;;  %v1291_v1 = vpop.permute.xlu1 %1290  ;;  %3385 = vmatmul.mubr.msk.f32.vlgmr.msra.gmra.mrb[0].mxu0 %vm3988_vm1, %v278_v62  ;;  %vm224_vm0 = vmand %vm216_vm12, %vm220_vm2 }
  0xbd   : > { %v1295_v2 = vsel %vm3983_vm6, %v1287_v58, %v1289_v63  ;;  %v1296_v3 = vsel %vm3983_vm6, %v1289_v63, %v1291_v1  ;;  %1536 = vmatprep.mubr.f32.mxu0 %v3570_v0  ;;  %v203_v58 = vsub.f32 %v182_v37, %v199_v53  ;;  %vm211_vm6 = vcmp.lt.f32.partialorder %v182_v37, 288.0 }
  0xbe   : > { %1375 = vmatprep.subr.mxu1 %v1296_v3 }
  0xbf   : > { %1376 = vmatpush1.msra.mxu1 %v1295_v2  ;;  %vm219_vm11 = vcmp.lt.f32.partialorder %v203_v58, 16.0 }
  0xc0   : > { %v1453_v4 = vpop.permute.xlu0 %1452  ;;  %v1455_v5 = vpop.permute.xlu1 %1454  ;;  %3386 = vmatmul.mubr.msk.f32.vlgmr.msra.gmra.mrb[0].mxu1 %vm3988_vm1, %v278_v62 }
  0xc1   : > { %v1462_v6 = vsel %vm3982_vm7, %v1453_v4, %v1455_v5  ;;  %1607 = vmatprep.mubr.f32.mxu1 %v3570_v0 }
  0xc2   : > { %1472 = vmatprep.subr.mxu0 %v1462_v6 }
  0xc4   : > { %v1451_v7 = vpop.permute.xlu0 %1450  ;;  %v1457_v8 = vpop.permute.xlu1 %1456 }
  0xc5   : > { %v1461_v10 = vsel %vm3982_vm7, %v1451_v7, %v1453_v4  ;;  %v1463_v14 = vsel %vm3982_vm7, %v1455_v5, %v1457_v8  ;;  %v3369_v5 = vsel %vm224_vm0, 1.0, %v3570_v0  ;;  %vm3579_vm0 = vmmov 0  }
  0xc6   : > { %1473 = vmatpush1.msra.mxu0 %v1461_v10 }
  0xc7   : > { %3387 = vmatmul.mubr.msk.f32.vlgmr.msra.gmra.mrb[0].mxu0 %vm3988_vm1, %v279_v9 }
  0xc8   : > { %v1459_v11 = vpop.permute.xlu0 %1458  ;;  %v1621_v12 = vpop.permute.xlu1 %1620  ;;  %1704 = vmatprep.mubr.f32.mxu0 %v3570_v0 }
  0xc9   : > { %v1464_v13 = vsel %vm3982_vm7, %v1457_v8, %v1459_v11  ;;  %vm207_vm7 = vcmp.ge.f32.partialorder %v182_v37, 0.0 }
  0xca   : > { %1543 = vmatprep.subr.mxu1 %v1464_v13  ;;  %vm215_vm3 = vmand %vm207_vm7, %vm211_vm6  ;;  %vm4001_vm6 = vcmask 1031168  }
  0xcb   : > { %1544 = vmatpush1.msra.mxu1 %v1463_v14  ;;  %vm4002_vm7 = vmmov %vm4001_vm6 }
  0xcc   : > { %v1623_v15 = vpop.permute.xlu0 %1622  ;;  %3388 = vmatmul.mubr.msk.f32.vlgmr.msra.gmra.mrb[0].mxu1 %vm3988_vm1, %v279_v9  ;;  %v1619_v16 = vpop.permute.xlu1 %1618 }
  0xcd   : > { %v1629_v17 = vsel %vm3981_vm8, %v1619_v16, %v1621_v12  ;;  %v1630_v18 = vsel %vm3981_vm8, %v1621_v12, %v1623_v15  ;;  %1775 = vmatprep.mubr.f32.mxu1 %v3570_v0 }
  0xce   : > { %1640 = vmatprep.subr.mxu0 %v1630_v18 }
  0xcf   : > { %1641 = vmatpush1.msra.mxu0 %v1629_v17 }
  0xd0   : > { %v1625_v20 = vpop.permute.xlu0 %1624  ;;  %3389 = vmatmul.mubr.msk.f32.vlgmr.msra.gmra.mrb[0].mxu0 %vm3988_vm1, %v280_v19  ;;  %v1627_v21 = vpop.permute.xlu1 %1626 }
  0xd1   : > { %v1631_v22 = vsel %vm3981_vm8, %v1623_v15, %v1625_v20  ;;  %v1632_v23 = vsel %vm3981_vm8, %v1625_v20, %v1627_v21  ;;  %1916 = vmatprep.mubr.f32.mxu0 %v3570_v0  ;;  %vm218_vm8 = vcmp.lt.f32.partialorder %v202_v52, 16.0 }
  0xd2   : > { %1711 = vmatprep.subr.mxu1 %v1632_v23  ;;  %vm222_vm4 = vmand %vm3815_vm15, %vm218_vm8  ;;  %vm4006_vm15 = vcmask 900096  }
  0xd3   : > { %1712 = vmatpush1.msra.mxu1 %v1631_v22  ;;  %v3367_v61 = vsel %vm222_vm4, 1.0, %v3570_v0  ;;  %vm3999_vm4 = vcmask 64512   ;;  %vm4003_vm8 = vmmov %vm4001_vm6 }
  0xd4   : > { %3390 = vmatmul.mubr.msk.f32.vlgmr.msra.gmra.mrb[0].mxu1 %vm3988_vm1, %v280_v19  ;;  %3429 = vmatprep.subr.mxu1 %v3570_v0  ;;  %vm223_vm1 = vmand %vm215_vm3, %vm219_vm11 }
  0xd5   : > { %v3368_v3 = vsel %vm223_vm1, 1.0, %v3570_v0  ;;  %3431 = vmatprep.mubr.msk.f32.mxu1 %vm3579_vm0, %v3570_v0  ;;  %vm3996_vm1 = vcmask 1039360   ;;  %vm4000_vm5 = vmmov %vm3999_vm4 }
  0xd6   : > { %vm3997_vm2 = vmmov %vm3996_vm1 }
  0xd7   : > { %vm3998_vm3 = vmmov %vm3996_vm1 }
  0xd8   : > { %vm4004_vm13 = vmmov %vm3999_vm4 }
  0xd9   : > { %vm4005_vm14 = vmmov %vm3999_vm4 }
  0xda   : > { %vm4007_vm9 = vmmov %vm4006_vm15 }
  0xdb   : > { %vm4008_vm10 = vmmov %vm4007_vm9 }
  0xdc   : > { %vm4009_vm11 = vmmov %vm3999_vm4 }
  0xdd   : > { %vm4010_vm12 = vmmov %vm3999_vm4 }
 0x1a3   : > { %v1706_v62 = vpop.f32.mrb[0].mxu0 }
 0x1a4   : > { %v1786_v63 = vmul.f32 %v3366_v60, %v1706_v62  ;;  %v1708_v1 = vpop.f32.mrb[1].mxu0 }
 0x1a5   : > { %v1787_v2 = vmul.f32 %v3367_v61, %v1708_v1 }
 0x1a6   : > { %v1796_v4 = vmul.f32 %v1786_v63, %v1706_v62 }
 0x1a7   : > { %v1797_v6 = vmul.f32 %v1787_v2, %v1708_v1  ;;  %v1777_v7 = vpop.f32.mrb[0].mxu1  ;;  %v1790_v8 = vadd.f32 %v1787_v2, %v1786_v63 }
 0x1a8   : > { %v1788_v9 = vmul.f32 %v3368_v3, %v1777_v7  ;;  %v1779_v10 = vpop.f32.mrb[1].mxu1 }
 0x1a9   : > { %v1789_v11 = vmul.f32 %v3369_v5, %v1779_v10  ;;  %v1800_v12 = vadd.f32 %v1797_v6, %v1796_v4 }
 0x1aa   : > { %v1798_v13 = vmul.f32 %v1788_v9, %v1777_v7  ;;  %v1791_v14 = vadd.f32 %v1790_v8, %v1788_v9  ;;  %v283_v9 = vld [vmem:[%s3979_s2 + $0x10] sm:$0xff] }
 0x1ab   : > { %v1799_v15 = vmul.f32 %v1789_v11, %v1779_v10 }
 0x1ac   : > { %v1792_v16 = vadd.f32 %v1791_v14, %v1789_v11  ;;  %v1801_v17 = vadd.f32 %v1800_v12, %v1798_v13 }
 0x1ae   : > { %1793 = vadd.xlane.f32.xlu0 %v1792_v16  ;;  %v1802_v18 = vadd.f32 %v1801_v17, %v1799_v15  ;;  %v284_v17 = vld [vmem:[%s3979_s2 + $0x18] sm:$0xff] }
 0x1b0   : > { %1803 = vadd.xlane.f32.xlu1 %v1802_v18 }
 0x23b   : > { %v1794_v19 = vpop.xlane.xlu0 %1793 }
 0x23c   : > { %v1795_v20 = vmul.f32 0.00390625, %v1794_v19 }
 0x23d   : > { %v1804_v21 = vpop.xlane.xlu1 %1803 }
 0x23e   : > { %v1805_v22 = vmul.f32 0.00390625, %v1804_v21  ;;  %v1806_v23 = vmul.f32 %v1795_v20, %v1795_v20  ;;  %v1809_v30 = vsub.f32 %v1706_v62, %v1795_v20  ;;  %v1810_v31 = vsub.f32 %v1708_v1, %v1795_v20  ;;  %v281_v1 = vld [vmem:[%s3979_s2] sm:$0xff] }
 0x23f   : > { %v1811_v32 = vsub.f32 %v1777_v7, %v1795_v20  ;;  %v1812_v33 = vsub.f32 %v1779_v10, %v1795_v20 }
 0x240   : > { %v1807_v24 = vsub.f32 %v1805_v22, %v1806_v23 }
 0x242   : > { %v1808_v27 = vmax.f32 %v1807_v24, 0.0 }
 0x244   : > { %v1813_v28 = vadd.f32 1e-05, %v1808_v27  ;;  %v285_v27 = vld [vmem:[%s3979_s2 + $0x20] sm:$0xff] }
 0x246   : > { %3558 = vrsqrt.f32 %v1813_v28 }
 0x250   : > { %v3559_v34 = vpop.eup %3558 }
 0x251   : > { %v1817_v35 = vmul.f32 %v3559_v34, %v1811_v32  ;;  %v1816_v36 = vmul.f32 %v3559_v34, %v1810_v31  ;;  %v1818_v37 = vmul.f32 %v3559_v34, %v1812_v33  ;;  %v1815_v38 = vmul.f32 %v3559_v34, %v1809_v30 }
 0x253   : > { %v1821_v39 = vmul.f32 0.2, %v1817_v35  ;;  %v1820_v40 = vmul.f32 0.2, %v1816_v36  ;;  %v1822_v41 = vmul.f32 0.2, %v1818_v37 }
 0x254   : > { %v1819_v42 = vmul.f32 0.2, %v1815_v38 }
 0x255   : > { %v1825_v43 = vmax.f32 %v1817_v35, %v1821_v39  ;;  %v1824_v44 = vmax.f32 %v1816_v36, %v1820_v40  ;;  %v1826_v47 = vmax.f32 %v1818_v37, %v1822_v41  ;;  %v286_v36 = vld [vmem:[%s3979_s2 + $0x28] sm:$0xff] }
 0x256   : > { %v1823_v48 = vmax.f32 %v1815_v38, %v1819_v42 }
 0x257   : > { %v1829_v45 = vmul.f32 %v3368_v3, %v1825_v43  ;;  %v1828_v46 = vmul.f32 %v3367_v61, %v1824_v44  ;;  %v1830_v49 = vmul.f32 %v3369_v5, %v1826_v47  ;;  %v287_v44 = vld [vmem:[%s3979_s2 + $0x30] sm:$0xff] }
 0x258   : > { %v1827_v50 = vmul.f32 %v3366_v60, %v1823_v48 }
 0x259   : > { %1839 = vrot.lane.b32.xlu1 %v1829_v45, %s3571_s18  ;;  %1837 = vrot.lane.b32.xlu0 %v1828_v46, %s3571_s18 }
 0x25d   : > { %1841 = vrot.lane.b32.xlu1 %v1830_v49, %s3571_s18  ;;  %1835 = vrot.lane.b32.xlu0 %v1827_v50, %s3571_s18 }
 0x261   : > { %2141 = vrot.lane.b32.xlu1 %v1829_v45, %s3572_s19  ;;  %2139 = vrot.lane.b32.xlu0 %v1828_v46, %s3572_s19 }
 0x265   : > { %2143 = vrot.lane.b32.xlu1 %v1830_v49, %s3572_s19  ;;  %2137 = vrot.lane.b32.xlu0 %v1827_v50, %s3572_s19 }
 0x269   : > { %2302 = vrot.lane.b32.xlu1 %v1829_v45, %s3573_s20  ;;  %2300 = vrot.lane.b32.xlu0 %v1828_v46, %s3573_s20 }
 0x26d   : > { %2304 = vrot.lane.b32.xlu1 %v1830_v49, %s3573_s20  ;;  %2298 = vrot.lane.b32.xlu0 %v1827_v50, %s3573_s20 }
 0x271   : > { %2463 = vrot.lane.b32.xlu1 %v1829_v45, %s3574_s21  ;;  %2461 = vrot.lane.b32.xlu0 %v1828_v46, %s3574_s21 }
 0x275   : > { %2465 = vrot.lane.b32.xlu1 %v1830_v49, %s3574_s21  ;;  %2459 = vrot.lane.b32.xlu0 %v1827_v50, %s3574_s21 }
 0x279   : > { %2624 = vrot.lane.b32.xlu1 %v1829_v45, %s3575_s22  ;;  %2622 = vrot.lane.b32.xlu0 %v1828_v46, %s3575_s22 }
 0x27d   : > { %2626 = vrot.lane.b32.xlu1 %v1830_v49, %s3575_s22  ;;  %2620 = vrot.lane.b32.xlu0 %v1827_v50, %s3575_s22 }
 0x281   : > { %2785 = vrot.lane.b32.xlu1 %v1829_v45, %s3576_s23  ;;  %2783 = vrot.lane.b32.xlu0 %v1828_v46, %s3576_s23 }
 0x285   : > { %2787 = vrot.lane.b32.xlu1 %v1830_v49, %s3576_s23  ;;  %2781 = vrot.lane.b32.xlu0 %v1827_v50, %s3576_s23 }
 0x289   : > { %2946 = vrot.lane.b32.xlu1 %v1829_v45, %s3577_s24  ;;  %2944 = vrot.lane.b32.xlu0 %v1828_v46, %s3577_s24 }
 0x28d   : > { %2948 = vrot.lane.b32.xlu1 %v1830_v49, %s3577_s24  ;;  %2942 = vrot.lane.b32.xlu0 %v1827_v50, %s3577_s24 }
 0x291   : > { %3107 = vrot.lane.b32.xlu1 %v1829_v45, %s3578_s25  ;;  %3105 = vrot.lane.b32.xlu0 %v1828_v46, %s3578_s25 }
 0x295   : > { %3109 = vrot.lane.b32.xlu1 %v1830_v49, %s3578_s25  ;;  %3103 = vrot.lane.b32.xlu0 %v1827_v50, %s3578_s25 }
 0x2cb   : > { %v1840_v51 = vpop.permute.xlu1 %1839  ;;  %v1838_v52 = vpop.permute.xlu0 %1837 }
 0x2cc   : > { %v1844_v53 = vsel %vm3996_vm1, %v1838_v52, %v1840_v51  ;;  %vm4011_vm1 = vcmask 891904  }
 0x2cd   : > { %1852 = vmatprep.subr.mxu0 %v1844_v53 }
 0x2cf   : > { %v1842_v54 = vpop.permute.xlu1 %1841  ;;  %v1836_v55 = vpop.permute.xlu0 %1835 }
 0x2d0   : > { %v1845_v57 = vsel %vm3997_vm2, %v1840_v51, %v1842_v54  ;;  %v1843_v58 = vsel %vm3998_vm3, %v1836_v55, %v1838_v52  ;;  %vm4012_vm2 = vmmov %vm4011_vm1  ;;  %v288_v52 = vld [vmem:[%s3979_s2 + $0x38] sm:$0xff]  ;;  %v289_v55 = vld [vmem:[%s3979_s2 + $0x40] sm:$0xff] }
 0x2d1   : > { %1853 = vmatpush1.msra.mxu0 %v1843_v58  ;;  %3430 = vmatpush3.msra.mxu1 %v1845_v57  ;;  %vm4013_vm3 = vmmov %vm4011_vm1  ;;  %v234_v57 = vcvt.s32.f32 %v3798_v26  ;;  %v235_v58 = vcvt.s32.f32 %v3803_v29 }
 0x2d2   : > { %3391 = vmatmul.mubr.msk.f32.vlgmr.msra.gmra.mrb[2].mxu0 %vm3999_vm4, %v282_v56  ;;  %3432 = vmatmul.mubr.msk.f32.vlgmr.msra.gmra.mrb[2].mxu1 %vm4000_vm5, %v282_v56  ;;  %vm4014_vm5 = vmmov %vm3999_vm4  ;;  %v233_v56 = vcvt.s32.f32 %v3795_v25 }
 0x2d3   : > { %1996 = vmatprep.subr.mxu0 %v1828_v46  ;;  %3434 = vmatprep.subr.mxu1 %v3570_v0  ;;  %v2142_v59 = vpop.permute.xlu1 %2141  ;;  %v2140_v60 = vpop.permute.xlu0 %2139 }
 0x2d4   : > { %3435 = vmatpush3.msra.mxu1 %v1829_v45  ;;  %1997 = vmatpush1.msra.mxu0 %v1827_v50  ;;  %v2146_v61 = vsel %vm4001_vm6, %v2140_v60, %v2142_v59  ;;  %vm4015_vm6 = vcmask 883712  }
 0x2d5   : > { %2154 = vmatprep.subr.mxu0 %v2146_v61  ;;  %2060 = vmatprep.mubr.f32.mxu0 %v3570_v0  ;;  %v238_v61 = vadd.f32 0.5, %v235_v58 }
 0x2d6   : > { %3436 = vmatprep.mubr.msk.f32.mxu1 %vm3579_vm0, %v3570_v0  ;;  %3439 = vmatprep.subr.mxu1 %v3570_v0 }
 0x2d7   : > { %v2144_v62 = vpop.permute.xlu1 %2143  ;;  %v2138_v63 = vpop.permute.xlu0 %2137 }
 0x2d8   : > { %v2147_v2 = vsel %vm4002_vm7, %v2142_v59, %v2144_v62  ;;  %v2145_v3 = vsel %vm4003_vm8, %v2138_v63, %v2140_v60  ;;  %vm4016_vm7 = vmmov %vm4015_vm6  ;;  %v236_v59 = vadd.f32 0.5, %v233_v56  ;;  %v237_v60 = vadd.f32 0.5, %v234_v57 }
 0x2d9   : > { %vm4017_vm8 = vmmov %vm4015_vm6 }
 0x2da   : > { %3393 = vmatmul.mubr.msk.f32.vlgmr.msra.gmra.mrb[2].mxu0 %vm4004_vm13, %v281_v1  ;;  %3437 = vmatmul.mubr.msk.f32.vlgmr.msra.gmra.mrb[2].mxu1 %vm4005_vm14, %v281_v1  ;;  %vm4018_vm13 = vmmov %vm3999_vm4  ;;  %v239_v62 = vmul.f32 0.055555556, %v236_v59  ;;  %v240_v63 = vmul.f32 0.055555556, %v237_v60  ;;  %v241_v1 = vmul.f32 0.055555556, %v238_v61 }
 0x2db   : > { %2155 = vmatpush1.msra.mxu0 %v2145_v3  ;;  %3440 = vmatpush3.msra.mxu1 %v2147_v2  ;;  %v2303_v4 = vpop.permute.xlu1 %2302  ;;  %v2301_v5 = vpop.permute.xlu0 %2300  ;;  %vm4019_vm14 = vmmov %vm3999_vm4 }
 0x2dc   : > { %v2307_v6 = vsel %vm4006_vm15, %v2301_v5, %v2303_v4  ;;  %2218 = vmatprep.mubr.f32.mxu0 %v3570_v0  ;;  %3441 = vmatprep.mubr.msk.f32.mxu1 %vm3579_vm0, %v3570_v0  ;;  %vm4020_vm15 = vcmask 752640   ;;  %v242_v2 = vfloor.f32 %v239_v62  ;;  %v243_v3 = vfloor.f32 %v240_v63 }
 0x2dd   : > { %2315 = vmatprep.subr.mxu0 %v2307_v6  ;;  %3444 = vmatprep.subr.mxu1 %v3570_v0 }
 0x2de   : > { %v246_v6 = vmul.f32 18.0, %v243_v3 }
 0x2df   : > { %v2305_v7 = vpop.permute.xlu1 %2304  ;;  %v2299_v8 = vpop.permute.xlu0 %2298 }
 0x2e0   : > { %v2308_v10 = vsel %vm4007_vm9, %v2303_v4, %v2305_v7  ;;  %v2306_v11 = vsel %vm4008_vm10, %v2299_v8, %v2301_v5  ;;  %vm4021_vm9 = vmmov %vm4020_vm15  ;;  %v244_v4 = vfloor.f32 %v241_v1  ;;  %v245_v5 = vmul.f32 18.0, %v242_v2 }
 0x2e1   : > { %vm4022_vm10 = vmmov %vm4021_vm9  ;;  %v249_v25 = vsub.f32 %v234_v57, %v246_v6 }
 0x2e2   : > { %3395 = vmatmul.mubr.msk.f32.vlgmr.msra.gmra.mrb[2].mxu0 %vm4009_vm11, %v283_v9  ;;  %3442 = vmatmul.mubr.msk.f32.vlgmr.msra.gmra.mrb[2].mxu1 %vm4010_vm12, %v283_v9  ;;  %vm4023_vm11 = vmmov %vm3999_vm4  ;;  %v247_v7 = vmul.f32 18.0, %v244_v4  ;;  %v248_v8 = vsub.f32 %v233_v56, %v245_v5 }
 0x2e3   : > { %2316 = vmatpush1.msra.mxu0 %v2306_v11  ;;  %3445 = vmatpush3.msra.mxu1 %v2308_v10  ;;  %v2464_v12 = vpop.permute.xlu1 %2463  ;;  %v2462_v13 = vpop.permute.xlu0 %2461  ;;  %vm4024_vm12 = vmmov %vm3999_vm4 }
 0x2e4   : > { %v2468_v14 = vsel %vm4011_vm1, %v2462_v13, %v2464_v12  ;;  %2379 = vmatprep.mubr.f32.mxu0 %v3570_v0  ;;  %3446 = vmatprep.mubr.msk.f32.mxu1 %vm3579_vm0, %v3570_v0  ;;  %vm4025_vm1 = vcmask 744448   ;;  %v250_v26 = vsub.f32 %v235_v58, %v247_v7 }
 0x2e5   : > { %2476 = vmatprep.subr.mxu0 %v2468_v14  ;;  %3449 = vmatprep.subr.mxu1 %v3570_v0 }
 0x2e7   : > { %v2466_v15 = vpop.permute.xlu1 %2465  ;;  %v2460_v16 = vpop.permute.xlu0 %2459 }
 0x2e8   : > { %v2469_v18 = vsel %vm4012_vm2, %v2464_v12, %v2466_v15  ;;  %v2467_v19 = vsel %vm4013_vm3, %v2460_v16, %v2462_v13  ;;  %vm4026_vm2 = vmmov %vm4025_vm1 }
 0x2e9   : > { %vm4027_vm3 = vmmov %vm4025_vm1 }
 0x2ea   : > { %3397 = vmatmul.mubr.msk.f32.vlgmr.msra.gmra.mrb[2].mxu0 %vm3999_vm4, %v284_v17  ;;  %3447 = vmatmul.mubr.msk.f32.vlgmr.msra.gmra.mrb[2].mxu1 %vm4014_vm5, %v284_v17  ;;  %vm4028_vm5 = vmmov %vm3999_vm4 }
 0x2eb   : > { %2477 = vmatpush1.msra.mxu0 %v2467_v19  ;;  %3450 = vmatpush3.msra.mxu1 %v2469_v18  ;;  %v2625_v20 = vpop.permute.xlu1 %2624  ;;  %v2623_v21 = vpop.permute.xlu0 %2622 }
 0x2ec   : > { %v2629_v22 = vsel %vm4015_vm6, %v2623_v21, %v2625_v20  ;;  %2540 = vmatprep.mubr.f32.mxu0 %v3570_v0  ;;  %3451 = vmatprep.mubr.msk.f32.mxu1 %vm3579_vm0, %v3570_v0  ;;  %vm4029_vm6 = vcmask 736256  }
 0x2ed   : > { %2637 = vmatprep.subr.mxu0 %v2629_v22  ;;  %3454 = vmatprep.subr.mxu1 %v3570_v0 }
 0x2ef   : > { %v2627_v23 = vpop.permute.xlu1 %2626  ;;  %v2621_v24 = vpop.permute.xlu0 %2620 }
 0x2f0   : > { %v2630_v28 = vsel %vm4016_vm7, %v2625_v20, %v2627_v23  ;;  %v2628_v30 = vsel %vm4017_vm8, %v2621_v24, %v2623_v21  ;;  %vm4030_vm7 = vmmov %vm4029_vm6 }
 0x2f1   : > { %vm4031_vm8 = vmmov %vm4029_vm6 }
 0x2f2   : > { %3399 = vmatmul.mubr.msk.f32.vlgmr.msra.gmra.mrb[2].mxu0 %vm4018_vm13, %v285_v27  ;;  %3452 = vmatmul.mubr.msk.f32.vlgmr.msra.gmra.mrb[2].mxu1 %vm4019_vm14, %v285_v27  ;;  %vm4032_vm13 = vmmov %vm3999_vm4 }
 0x2f3   : > { %2638 = vmatpush1.msra.mxu0 %v2628_v30  ;;  %3455 = vmatpush3.msra.mxu1 %v2630_v28  ;;  %v2786_v31 = vpop.permute.xlu1 %2785  ;;  %v2784_v32 = vpop.permute.xlu0 %2783  ;;  %vm4033_vm14 = vmmov %vm3999_vm4 }
 0x2f4   : > { %v2790_v33 = vsel %vm4020_vm15, %v2784_v32, %v2786_v31  ;;  %2701 = vmatprep.mubr.f32.mxu0 %v3570_v0  ;;  %3456 = vmatprep.mubr.msk.f32.mxu1 %vm3579_vm0, %v3570_v0  ;;  %vm4034_vm15 = vmmov %vm3999_vm4 }
 0x2f5   : > { %2798 = vmatprep.subr.mxu0 %v2790_v33  ;;  %3459 = vmatprep.subr.mxu1 %v3570_v0 }
 0x2f7   : > { %v2788_v34 = vpop.permute.xlu1 %2787  ;;  %v2782_v35 = vpop.permute.xlu0 %2781 }
 0x2f8   : > { %v2791_v37 = vsel %vm4021_vm9, %v2786_v31, %v2788_v34  ;;  %v2789_v38 = vsel %vm4022_vm10, %v2782_v35, %v2784_v32  ;;  %vm4035_vm9 = vmmov %vm3999_vm4  ;;  %vm254_vm10 = vcmp.lt.f32.partialorder %v233_v56, 288.0 }
 0x2fa   : > { %3401 = vmatmul.mubr.msk.f32.vlgmr.msra.gmra.mrb[2].mxu0 %vm4023_vm11, %v286_v36  ;;  %3457 = vmatmul.mubr.msk.f32.vlgmr.msra.gmra.mrb[2].mxu1 %vm4024_vm12, %v286_v36  ;;  %vm252_vm11 = vcmp.ge.f32.partialorder %v234_v57, 0.0  ;;  %vm255_vm12 = vcmp.lt.f32.partialorder %v234_v57, 288.0 }
 0x2fb   : > { %2799 = vmatpush1.msra.mxu0 %v2789_v38  ;;  %3460 = vmatpush3.msra.mxu1 %v2791_v37  ;;  %v2947_v39 = vpop.permute.xlu1 %2946  ;;  %v2945_v40 = vpop.permute.xlu0 %2944 }
 0x2fc   : > { %v2951_v41 = vsel %vm4025_vm1, %v2945_v40, %v2947_v39  ;;  %2862 = vmatprep.mubr.f32.mxu0 %v3570_v0  ;;  %3461 = vmatprep.mubr.msk.f32.mxu1 %vm3579_vm0, %v3570_v0  ;;  %vm253_vm1 = vcmp.ge.f32.partialorder %v235_v58, 0.0 }
 0x2fd   : > { %2959 = vmatprep.subr.mxu0 %v2951_v41  ;;  %3464 = vmatprep.subr.mxu1 %v3570_v0 }
 0x2ff   : > { %v2949_v42 = vpop.permute.xlu1 %2948  ;;  %v2943_v43 = vpop.permute.xlu0 %2942 }
 0x300   : > { %v2952_v45 = vsel %vm4026_vm2, %v2947_v39, %v2949_v42  ;;  %v2950_v46 = vsel %vm4027_vm3, %v2943_v43, %v2945_v40  ;;  %vm256_vm2 = vcmp.lt.f32.partialorder %v235_v58, 288.0 }
 0x302   : > { %3403 = vmatmul.mubr.msk.f32.vlgmr.msra.gmra.mrb[2].mxu0 %vm3999_vm4, %v287_v44  ;;  %3462 = vmatmul.mubr.msk.f32.vlgmr.msra.gmra.mrb[2].mxu1 %vm4028_vm5, %v287_v44  ;;  %vm260_vm4 = vcmp.lt.f32.partialorder %v248_v8, 16.0  ;;  %vm258_vm5 = vmand %vm252_vm11, %vm255_vm12 }
 0x303   : > { %2960 = vmatpush1.msra.mxu0 %v2950_v46  ;;  %3465 = vmatpush3.msra.mxu1 %v2952_v45  ;;  %v3108_v47 = vpop.permute.xlu1 %3107  ;;  %v3106_v48 = vpop.permute.xlu0 %3105 }
 0x304   : > { %v3112_v49 = vsel %vm4029_vm6, %v3106_v48, %v3108_v47  ;;  %3023 = vmatprep.mubr.f32.mxu0 %v3570_v0  ;;  %3466 = vmatprep.mubr.msk.f32.mxu1 %vm3579_vm0, %v3570_v0  ;;  %vm261_vm6 = vcmp.lt.f32.partialorder %v249_v25, 16.0 }
 0x305   : > { %3120 = vmatprep.subr.mxu0 %v3112_v49  ;;  %3469 = vmatprep.subr.mxu1 %v3570_v0 }
 0x307   : > { %v3110_v50 = vpop.permute.xlu1 %3109  ;;  %v3104_v51 = vpop.permute.xlu0 %3103 }
 0x308   : > { %v3113_v53 = vsel %vm4030_vm7, %v3108_v47, %v3110_v50  ;;  %v3111_v54 = vsel %vm4031_vm8, %v3104_v51, %v3106_v48  ;;  %vm259_vm7 = vmand %vm253_vm1, %vm256_vm2  ;;  %vm262_vm8 = vcmp.lt.f32.partialorder %v250_v26, 16.0 }
 0x30a   : > { %3405 = vmatmul.mubr.msk.f32.vlgmr.msra.gmra.mrb[2].mxu0 %vm4032_vm13, %v288_v52  ;;  %3467 = vmatmul.mubr.msk.f32.vlgmr.msra.gmra.mrb[2].mxu1 %vm4033_vm14, %v288_v52  ;;  %vm264_vm14 = vmand %vm258_vm5, %vm261_vm6 }
 0x30b   : > { %3121 = vmatpush1.msra.mxu0 %v3111_v54  ;;  %3470 = vmatpush3.msra.mxu1 %v3113_v53  ;;  %v3371_v9 = vsel %vm264_vm14, 1.0, %v3570_v0 }
 0x30c   : > { %3184 = vmatprep.mubr.f32.mxu0 %v3570_v0  ;;  %3471 = vmatprep.mubr.msk.f32.mxu1 %vm3579_vm0, %v3570_v0  ;;  %vm251_vm0 = vcmp.ge.f32.partialorder %v233_v56, 0.0 }
 0x30d   : > { %vm257_vm3 = vmand %vm251_vm0, %vm254_vm10 }
 0x30e   : > { %vm263_vm13 = vmand %vm257_vm3, %vm260_vm4 }
 0x30f   : > { %v3370_v29 = vsel %vm263_vm13, 1.0, %v3570_v0 }
 0x312   : > { %3407 = vmatmul.mubr.msk.f32.vlgmr.msra.gmra.mrb[2].mxu0 %vm4034_vm15, %v289_v55  ;;  %3472 = vmatmul.mubr.msk.f32.vlgmr.msra.gmra.mrb[2].mxu1 %vm4035_vm9, %v289_v55  ;;  %vm265_vm15 = vmand %vm259_vm7, %vm262_vm8 }
 0x313   : > { %v3372_v10 = vsel %vm265_vm15, 1.0, %v3570_v0 }
 0x3e5   : > { %v3186_v11 = vpop.f32.mrb[2].mxu0  ;;  %v3257_v12 = vpop.f32.mrb[2].mxu1 }
 0x3e6   : > { %v3264_v13 = vmul.f32 %v3370_v29, %v3186_v11  ;;  %v3188_v14 = vpop.f32.mrb[3].mxu0  ;;  %v3473_v15 = vpop.f32.mrb[3].mxu1  ;;  %v3266_v17 = vmul.f32 %v3372_v10, %v3257_v12 }
 0x3e7   : > { %v3265_v16 = vmul.f32 %v3371_v9, %v3188_v14 }
 0x3e8   : > { %v3272_v18 = vmul.f32 %v3264_v13, %v3186_v11  ;;  %v3274_v22 = vmul.f32 %v3266_v17, %v3257_v12 }
 0x3e9   : > { %v3273_v19 = vmul.f32 %v3265_v16, %v3188_v14  ;;  %v3267_v20 = vadd.f32 %v3265_v16, %v3264_v13 }
 0x3eb   : > { %v3268_v21 = vadd.f32 %v3267_v20, %v3266_v17  ;;  %v3275_v23 = vadd.f32 %v3273_v19, %v3272_v18 }
 0x3ed   : > { %3269 = vadd.xlane.f32.xlu0 %v3268_v21  ;;  %v3276_v24 = vadd.f32 %v3275_v23, %v3274_v22 }
 0x3ef   : > { %3277 = vadd.xlane.f32.xlu1 %v3276_v24 }
 0x47a   : > { %v3270_v27 = vpop.xlane.xlu0 %3269 }
 0x47b   : > { %v3271_v28 = vmul.f32 0.00390625, %v3270_v27 }
 0x47c   : > { %v3278_v0 = vpop.xlane.xlu1 %3277 }
 0x47d   : > { %v3279_v30 = vmul.f32 0.00390625, %v3278_v0  ;;  %v3280_v31 = vmul.f32 %v3271_v28, %v3271_v28  ;;  %v3283_v35 = vsub.f32 %v3186_v11, %v3271_v28  ;;  %v3284_v36 = vsub.f32 %v3188_v14, %v3271_v28 }
 0x47e   : > { %v3285_v37 = vsub.f32 %v3257_v12, %v3271_v28 }
 0x47f   : > { %v3281_v32 = vsub.f32 %v3279_v30, %v3280_v31 }
 0x481   : > { %v3282_v33 = vmax.f32 %v3281_v32, 0.0 }
 0x483   : > { %v3286_v34 = vadd.f32 1e-05, %v3282_v33 }
 0x485   : > { %3560 = vrsqrt.f32 %v3286_v34 }
 0x48f   : > { %v3561_v38 = vpop.eup %3560 }
 0x490   : > { %v3288_v39 = vmul.f32 %v3561_v38, %v3283_v35  ;;  %v3289_v40 = vmul.f32 %v3561_v38, %v3284_v36  ;;  %v3290_v41 = vmul.f32 %v3561_v38, %v3285_v37 }
 0x492   : > { %v3291_v42 = vmul.f32 0.2, %v3288_v39  ;;  %v3292_v43 = vmul.f32 0.2, %v3289_v40  ;;  %v3293_v44 = vmul.f32 0.2, %v3290_v41 }
 0x494   : > { %v3294_v45 = vmax.f32 %v3288_v39, %v3291_v42  ;;  %v3295_v46 = vmax.f32 %v3289_v40, %v3292_v43  ;;  %v3296_v47 = vmax.f32 %v3290_v41, %v3293_v44 }
 0x496   : > { %3297 = vst [vmem:[%s170_s15] sm:$0xff] %v3294_v45  ;;  %3298 = vst [vmem:[%s170_s15 + $0x8] sm:$0xff] %v3295_v46 }
 0x497   : > { %3299 = vst [vmem:[%s170_s15 + $0x10] sm:$0xff] %v3296_v47 }
 0x498 PF: > { %s13_s12 = sadd.s32 1, %s3568_s12  }
 0x499   : > { %p10_p4 = scmp.ge.s32.totalorder %s13_s12, 4  }
 0x49b   :  { %12 = sbr.rel (!%p10_p4) target bundleno = 1 (0x1), region = 62 }

</bundles_post_ra>
